<compile_context>
chip_gen: v7x
topology: tpu7x:2x2x1
jax: 0.10.0
libtpu: 0.0.40
codegen_flags: <defaults>
</compile_context>

<pallas_src>
import jax
import jax.numpy as jnp
from jax.experimental import pallas as pl
from jax.experimental.pallas import tpu as pltpu


def _round_up(v, m):
    return ((v + m - 1) // m) * m


def _linear_kernel(x_ref, w_ref, b_ref, o_ref, acc_ref):
    # grid = (m_tiles, n_tiles, k_tiles); K is the innermost (reduction) axis.
    k = pl.program_id(2)

    @pl.when(k == 0)
    def _():
        acc_ref[...] = jnp.zeros_like(acc_ref)

    # bf16 x bf16 MXU matmul, f32 accumulation.
    acc_ref[...] += jnp.dot(
        x_ref[...].astype(w_ref.dtype),
        w_ref[...],
        preferred_element_type=jnp.float32,
    )

    @pl.when(k == pl.num_programs(2) - 1)
    def _():
        o_ref[...] = (acc_ref[...] + b_ref[...].astype(jnp.float32)).astype(o_ref.dtype)


def prepare_classifier_params(weight, bias, compute_dtype=jnp.bfloat16):
    """One-time layout work (run at parameter-load time, NOT per forward).

    weight: [num_class, in_features]  (PyTorch nn.Linear convention)
    bias:   [num_class]
    Returns a dict with a lane-dense [in_features, n_pad] slab in compute_dtype
    and a [1, n_pad] f32 bias row (zero-padded columns -> padded outputs are exact
    zeros / pure bias and get sliced off).
    """
    num_class, in_features = weight.shape
    n128 = _round_up(num_class, 128)
    # For large heads use 256-wide N tiles (fills v6e/v7x 256-wide MXU); keep n_pad
    # an exact multiple of the N tile so no partial weight columns are ever read.
    n_pad = n128 if n128 <= 512 else _round_up(num_class, 256)

    w_slab = jnp.zeros((in_features, n_pad), compute_dtype)
    w_slab = w_slab.at[:, :num_class].set(weight.T.astype(compute_dtype))
    b_row = jnp.zeros((1, n_pad), jnp.float32)
    b_row = b_row.at[0, :num_class].set(bias.astype(jnp.float32))

    return {
        "w": w_slab,
        "b": b_row,
        "num_class": int(num_class),
        "in_features": int(in_features),
        "n_pad": int(n_pad),
    }


def _choose_tiles(M, K, n_pad):
    # Rows per step: multiple of 16 (bf16 sublane packing), up to 256 to amortize the
    # ~0.35us per-grid-step overhead and fill the MXU M dimension.
    tm = min(256, _round_up(max(M, 1), 16))
    # K tile must divide K exactly (a partial K block would pull garbage into the sum).
    tk = K
    if K % 128 == 0:
        for cand in (2048, 1024, 512):
            if K % cand == 0:
                tk = cand
                break
    # N tile: single block for small heads, 256-wide tiles (divides n_pad) otherwise.
    tn = n_pad if n_pad <= 512 else 256
    return tm, tk, tn


def classification_forward(x, params, d_model, factor, *, use_pallas=None):
    """Pallas port of ClassificationModule.forward using prepared params."""
    in_features = int(d_model * factor)
    assert in_features == params["in_features"]
    num_class = params["num_class"]
    n_pad = params["n_pad"]
    w, b = params["w"], params["b"]

    x_flat = x.reshape(-1, in_features)
    M, K = x_flat.shape

    if use_pallas is None:
        # Tiny problems: pallas_call launch + prologue dwarfs the matmul; use fused XLA GEMM.
        use_pallas = (M * K * num_class) >= (1 << 22)

    if not use_pallas:
        y = jnp.dot(x_flat.astype(w.dtype), w, preferred_element_type=jnp.float32) + b
        return y[:, :num_class].astype(x.dtype)

    tm, tk, tn = _choose_tiles(M, K, n_pad)
    grid = (pl.cdiv(M, tm), n_pad // tn, K // tk)

    x_bytes = x_flat.dtype.itemsize
    w_bytes = w.dtype.itemsize

    # Double-buffered x/w/bias/out blocks + f32 accumulator, with headroom.
    vmem_est = (
        2 * (tm * tk * x_bytes + tk * tn * w_bytes + 8 * tn * 4 + tm * tn * 4)
        + tm * tn * 4
    )
    vmem_limit = int(min(100 * 1024 * 1024, max(32 * 1024 * 1024, 2 * vmem_est)))

    cost = pl.CostEstimate(
        flops=2 * M * K * n_pad,
        transcendentals=0,
        bytes_accessed=M * K * x_bytes + K * n_pad * w_bytes + M * n_pad * 4 + n_pad * 4,
    )

    out = pl.pallas_call(
        _linear_kernel,
        out_shape=jax.ShapeDtypeStruct((M, n_pad), jnp.float32),
        grid_spec=pltpu.PrefetchScalarGridSpec(
            num_scalar_prefetch=0,
            grid=grid,
            in_specs=[
                pl.BlockSpec((tm, tk), lambda i, j, k: (i, k)),   # x rows / K slab
                pl.BlockSpec((tk, tn), lambda i, j, k: (k, j)),   # weight tile (bf16)
                pl.BlockSpec((1, tn), lambda i, j, k: (0, j)),    # bias row
            ],
            out_specs=pl.BlockSpec((tm, tn), lambda i, j, k: (i, j)),
            scratch_shapes=[pltpu.VMEM((tm, tn), jnp.float32)],   # f32 accumulator
        ),
        compiler_params=pltpu.CompilerParams(
            dimension_semantics=("parallel", "parallel", "arbitrary"),
            vmem_limit_bytes=vmem_limit,
        ),
        cost_estimate=cost,
    )(x_flat, w, b)

    return out[:, :num_class].astype(x.dtype)


def classification_module(x, weight, bias, d_model, factor, **kwargs):
    """Convenience wrapper (does the one-time param prep inline)."""
    params = prepare_classifier_params(weight, bias)
    return classification_forward(x, params, d_model, factor, **kwargs)


if __name__ == "__main__":
    # Small shapes consistent with the module: x is [batch, factor, d_model] so
    # view(-1, factor*d_model) flattens each sample.
    d_model, factor, num_class = 32, 8, 10
    N = 2

    key = jax.random.PRNGKey(0)
    kx, kw, kb = jax.random.split(key, 3)

    x = jax.random.normal(kx, (N, factor, d_model), jnp.float32)
    # nn.init.normal_(weight, std=0.02); nn.init.normal_(bias, 0) -> mean 0, std 1
    weight = 0.02 * jax.random.normal(kw, (num_class, d_model * factor), jnp.float32)
    bias = jax.random.normal(kb, (num_class,), jnp.float32)

    # One-time parameter layout (transpose / pad / bf16 cast) — outside the forward path.
    params = prepare_classifier_params(weight, bias)

    # Force the Pallas path so the kernel is actually exercised at this tiny size.
    out = classification_forward(x, params, d_model, factor, use_pallas=True)
    out = jax.block_until_ready(out)

    # Pure-JAX f32 reference of the PyTorch forward.
    ref = x.reshape(-1, d_model * factor) @ weight.T + bias

    assert out.shape == (N, num_class), out.shape
    err = float(jnp.max(jnp.abs(out - ref)))
    # bf16 MXU operands with f32 accumulation -> allow ~1e-2 level error.
    assert err < 2e-2, f"max abs err {err}"
    print("KERNEL_OK")
</pallas_src>

<mosaic_0001>
module attributes {stable_mosaic.version = 11 : i64} {
  func.func @_linear_kernel(%arg0: i32, %arg1: i32, %arg2: i32, %arg3: memref<16x256xf32, #tpu.memory_space<vmem>>, %arg4: memref<256x128xbf16, #tpu.memory_space<vmem>>, %arg5: memref<1x128xf32, #tpu.memory_space<vmem>>, %arg6: memref<16x128xf32, #tpu.memory_space<vmem>>, %arg7: memref<16x128xf32, #tpu.memory_space<vmem>>) attributes {dimension_semantics = [#tpu.dimension_semantics<parallel>, #tpu.dimension_semantics<parallel>, #tpu.dimension_semantics<arbitrary>], iteration_bounds = array<i64: 1, 1, 1>, scalar_prefetch = 0 : i64, scratch_operands = 1 : i64, tpu.core_type = #tpu.core_type<tc>, window_params = [{transform_indices = @transform_0, window_bounds = array<i64: 16, 256>}, {transform_indices = @transform_1, window_bounds = array<i64: 256, 128>}, {transform_indices = @transform_2, window_bounds = array<i64: 1, 128>}, {transform_indices = @transform_3, window_bounds = array<i64: 16, 128>}]} {
    %c0_i32 = arith.constant 0 : i32
    %0 = arith.cmpi eq, %arg2, %c0_i32 : i32
    %1 = arith.extui %0 : i1 to i32
    %c0_i32_0 = arith.constant 0 : i32
    %2 = arith.cmpi ne, %1, %c0_i32_0 : i32
    scf.if %2 {
      %cst_10 = arith.constant 0.000000e+00 : f32
      %13 = vector.broadcast %cst_10 : f32 to vector<16x128xf32>
      %c0_11 = arith.constant 0 : index
      %c0_12 = arith.constant 0 : index
      %14 = vector.load %arg7[%c0_11, %c0_12] : memref<16x128xf32, #tpu.memory_space<vmem>>, vector<16x128xf32>
      tpu.vector_store %arg7[%c0_11, %c0_12], %13 {strides = array<i32>} : memref<16x128xf32, #tpu.memory_space<vmem>>, vector<16x128xf32>,
    } else {
    }
    %c0 = arith.constant 0 : index
    %c0_1 = arith.constant 0 : index
    %3 = vector.load %arg7[%c0, %c0_1] : memref<16x128xf32, #tpu.memory_space<vmem>>, vector<16x128xf32>
    %c0_2 = arith.constant 0 : index
    %c0_3 = arith.constant 0 : index
    %4 = vector.load %arg3[%c0_2, %c0_3] : memref<16x256xf32, #tpu.memory_space<vmem>>, vector<16x256xf32>
    %5 = arith.truncf %4 : vector<16x256xf32> to vector<16x256xbf16>
    %c0_4 = arith.constant 0 : index
    %c0_5 = arith.constant 0 : index
    %6 = vector.load %arg4[%c0_4, %c0_5] : memref<256x128xbf16, #tpu.memory_space<vmem>>, vector<256x128xbf16>
    %cst = arith.constant dense<0.000000e+00> : vector<16x128xf32>
    %7 = tpu.matmul %5, %6, %cst {dimension_numbers = #tpu.dot_dimension_numbers<[1], [0], [0], [1], [0, 0, 1, 1], [], []>} : vector<16x256xbf16>, vector<256x128xbf16>, vector<16x128xf32> -> vector<16x128xf32>
    %8 = arith.addf %3, %7 : vector<16x128xf32>
    %c0_6 = arith.constant 0 : index
    %c0_7 = arith.constant 0 : index
    %9 = vector.load %arg7[%c0_6, %c0_7] : memref<16x128xf32, #tpu.memory_space<vmem>>, vector<16x128xf32>
    tpu.vector_store %arg7[%c0_6, %c0_7], %8 {strides = array<i32>} : memref<16x128xf32, #tpu.memory_space<vmem>>, vector<16x128xf32>,
    %c0_i32_8 = arith.constant 0 : i32
    %10 = arith.cmpi eq, %arg2, %c0_i32_8 : i32
    %11 = arith.extui %10 : i1 to i32
    %c0_i32_9 = arith.constant 0 : i32
    %12 = arith.cmpi ne, %11, %c0_i32_9 : i32
    scf.if %12 {
      %c0_10 = arith.constant 0 : index
      %c0_11 = arith.constant 0 : index
      %13 = vector.load %arg7[%c0_10, %c0_11] : memref<16x128xf32, #tpu.memory_space<vmem>>, vector<16x128xf32>
      %c0_12 = arith.constant 0 : index
      %c0_13 = arith.constant 0 : index
      %14 = vector.load %arg5[%c0_12, %c0_13] : memref<1x128xf32, #tpu.memory_space<vmem>>, vector<1x128xf32>
      %15 = vector.broadcast %14 : vector<1x128xf32> to vector<16x128xf32>
      %16 = arith.addf %13, %15 : vector<16x128xf32>
      %c0_14 = arith.constant 0 : index
      %c0_15 = arith.constant 0 : index
      %17 = vector.load %arg6[%c0_14, %c0_15] : memref<16x128xf32, #tpu.memory_space<vmem>>, vector<16x128xf32>
      tpu.vector_store %arg6[%c0_14, %c0_15], %16 {strides = array<i32>} : memref<16x128xf32, #tpu.memory_space<vmem>>, vector<16x128xf32>,
    } else {
    }
    return
  }
  func.func @transform_0(%arg0: i32, %arg1: i32, %arg2: i32) -> (i32, i32) {
    %c0_i32 = arith.constant 0 : i32
    return %arg0, %arg2 : i32, i32
  }
  func.func @transform_1(%arg0: i32, %arg1: i32, %arg2: i32) -> (i32, i32) {
    %c0_i32 = arith.constant 0 : i32
    return %arg2, %arg1 : i32, i32
  }
  func.func @transform_2(%arg0: i32, %arg1: i32, %arg2: i32) -> (i32, i32) {
    %c0_i32 = arith.constant 0 : i32
    %c0_i32_0 = arith.constant 0 : i32
    return %c0_i32, %arg1 : i32, i32
  }
  func.func @transform_3(%arg0: i32, %arg1: i32, %arg2: i32) -> (i32, i32) {
    %c0_i32 = arith.constant 0 : i32
    return %arg0, %arg1 : i32, i32
  }
}

</mosaic_0001>

<bundles_post_ra>
// kernel: tpu_custom_call.1
= control target key start
LH: loop header
LB: loop body
LE: loop exit
PB: predicated region body
PF: predicated region fallthrough
CT: control target
= control target key end

     0   :  { %8 = vsyncpa [#allocation4], 0  ;;  %s526_s0 = inlined_call_operand.hbm [shape: f32[2,256], index: 0, kind: input, shape index: {}]   ;;  %s527_s1 = inlined_call_operand.hbm [shape: bf16[256,128], index: 1, kind: input, shape index: {}]   ;;  %s528_s2 = inlined_call_operand.vmem [shape: f32[1,128], index: 2, kind: input, shape index: {}]   ;;  %s529_s3 = inlined_call_operand.hbm [shape: f32[2,128], index: 3, kind: output, shape index: {}]  }
   0x1   :  { %9 = vsyncpa [#allocation7], 0 }
   0x2   :  { %10 = vsyncpa [#allocation5], 0 }
   0x3   :  { %15 = vsyncadd [#allocation4], 448  ;;  %s460_s12 = smov [#allocation3]   ;;  %s388_s16 = scalar_lea.hbm %s526_s0, 64 }
   0x4   :  { %s16_s13 = sshll.u32 %s460_s12, 4  ;;  %p389_p0 = scmp.ne.s32.totalorder %s526_s0, %s388_s16  ;;  %s17_s13 = int_to_ptr.vmem [resolvable:$true] %s16_s13 }
   0x5   :  { %p392_p1 = scmp.lt.u32.totalorder %s388_s16, %s526_s0 }
   0x7   :  { %p394_p2 = pnand %p392_p1, %p389_p0 }
   0x9   :  { %397 = shalt.err (!%p394_p2)
}
   0xa   :  { %s398_s21 = scalar_lea.vmem %s17_s13, 64  ;;  %s402_s22 = scalar_lea.vmem %s17_s13, 512 }
   0xb   :  { %p399_p3 = scmp.ne.s32.totalorder %s17_s13, %s398_s21  ;;  %p403_p4 = scmp.lt.s32.totalorder %s17_s13, %s17_s13 }
   0xc   :  { %p404_p5 = scmp.lt.s32.totalorder %s402_s22, %s398_s21 }
   0xe   :  { %p405_p6 = por %p404_p5, %p403_p4 }
  0x10   :  { %p406_p7 = pnand %p405_p6, %p399_p3 }
  0x12   :  { %409 = shalt.err (!%p406_p7)
}
  0x13   :  { %s461_s23 = smov 64   ;;  %s462_s24 = smov 4  }
  0x14   :  { %22 = dma.hbm_to_vmem [thread:$0]  %s526_s0, 64, %s17_s13, [#allocation4], %s461_s23, %s461_s23, %s462_s24  }
  0x15   :  { %s463_s27 = smov [#allocation6]   ;;  %s410_s4 = scalar_lea.hbm %s527_s1, 2048 }
  0x16   :  { %s28_s28 = sshll.u32 %s463_s27, 4  ;;  %p411_p8 = scmp.ne.s32.totalorder %s527_s1, %s410_s4  ;;  %s29_s28 = int_to_ptr.vmem [resolvable:$true] %s28_s28 }
  0x17   :  { %p414_p9 = scmp.lt.u32.totalorder %s410_s4, %s527_s1 }
  0x19   :  { %p416_p10 = pnand %p414_p9, %p411_p8 }
  0x1b   :  { %419 = shalt.err (!%p416_p10)
}
  0x1c   :  { %s420_s9 = scalar_lea.vmem %s29_s28, 2048  ;;  %p425_p12 = scmp.lt.s32.totalorder %s29_s28, %s29_s28 }
  0x1d   :  { %p421_p11 = scmp.ne.s32.totalorder %s29_s28, %s420_s9  ;;  %p426_p13 = scmp.lt.s32.totalorder %s420_s9, %s420_s9 }
  0x1f   :  { %p427_p0 = por %p426_p13, %p425_p12 }
  0x21   :  { %p428_p1 = pnand %p427_p0, %p421_p11 }
  0x23   :  { %431 = shalt.err (!%p428_p1)
}
  0x24   :  { %34 = dma.hbm_to_vmem [thread:$0]  %s527_s1, 2048, %s29_s28, [#allocation7], %s461_s23, %s461_s23, %s462_s24  }
  0x25   :  { %454 = dma.done.wait [#allocation4], 512  }
  0x26   :  { %455 = vsyncadd [#allocation4], 4294966784 }
  0x27   :  { %456 = dma.done.wait [#allocation7], 2048  }
  0x28   :  { %457 = vsyncadd [#allocation7], 4294965248  ;;  %v364_v0 = vld [vmem:[#allocation6 + $0x40] sm:$0xff]   ;;  %v366_v2 = vld [vmem:[#allocation6 + $0x48] sm:$0xff]  }
  0x29   :  { %v365_v1 = vld [vmem:[#allocation6] sm:$0xff]   ;;  %334 = vmatprep.subr.bf16.mxu0 %v364_v0  ;;  %v367_v3 = vld [vmem:[#allocation6 + $0x8] sm:$0xff]   ;;  %v368_v4 = vld [vmem:[#allocation6 + $0x50] sm:$0xff]  }
  0x2a   :  { %335 = vmatpush3.bf16.msra.mxu0 %v365_v1  ;;  %v369_v5 = vld [vmem:[#allocation6 + $0x10] sm:$0xff]   ;;  %v370_v6 = vld [vmem:[#allocation6 + $0x58] sm:$0xff]   ;;  %v372_v8 = vld [vmem:[#allocation6 + $0x60] sm:$0xff]  }
  0x2b   :  { %336 = vmatprep.subr.bf16.mxu0 %v366_v2  ;;  %v371_v7 = vld [vmem:[#allocation6 + $0x18] sm:$0xff]   ;;  %v373_v9 = vld [vmem:[#allocation6 + $0x20] sm:$0xff]   ;;  %v374_v10 = vld [vmem:[#allocation6 + $0x68] sm:$0xff]  }
  0x2c   :  { %v375_v11 = vld [vmem:[#allocation6 + $0x28] sm:$0xff]   ;;  %v384_v12 = vld.sshfl [vmem:[#allocation3] sm:$0xff pattern:$0x76325410]  ;;  %v376_v16 = vld [vmem:[#allocation6 + $0x70] sm:$0xff]  }
  0x2d   :  { %v385_v13 = vld.sshfl [vmem:[#allocation3 + $0x8] sm:$0xff pattern:$0x76325410]  ;;  %v386_v14 = vld.sshfl [vmem:[#allocation3 + $0x10] sm:$0xff pattern:$0x76325410] }
  0x2e   :  { %337 = vmatpush3.bf16.msra.mxu0 %v367_v3  ;;  %v387_v15 = vld.sshfl [vmem:[#allocation3 + $0x18] sm:$0xff pattern:$0x76325410]  ;;  %v377_v17 = vld [vmem:[#allocation6 + $0x30] sm:$0xff]   ;;  %v85_v18 = vcombine.high %v384_v12, %v385_v13  ;;  %v84_v22 = vcombine.low %v384_v12, %v385_v13  ;;  %v333_v28 = vld [vmem:[%s528_s2] ss:$0 sm:$0xff] }
  0x2f   :  { %338 = vmatprep.subr.bf16.mxu0 %v368_v4  ;;  %v103_v19 = vcombine.high %v386_v14, %v387_v15  ;;  %v378_v20 = vld [vmem:[#allocation6 + $0x78] sm:$0xff]   ;;  %v102_v23 = vcombine.low %v386_v14, %v387_v15 }
  0x30   :  { %v379_v24 = vld [vmem:[#allocation6 + $0x38] sm:$0xff]  }
  0x31   :  { %v109_v21 = vpack.c.bf16 %v103_v19, %v85_v18  ;;  %v108_v25 = vpack.c.bf16 %v102_v23, %v84_v22 }
  0x32   :  { %339 = vmatpush3.bf16.msra.mxu0 %v369_v5 }
  0x33   :  { %340 = vmatprep.subr.bf16.mxu0 %v370_v6  ;;  %270 = vmatprep.mubr.bf16.mxu0 %v109_v21 }
  0x36   :  { %341 = vmatpush3.bf16.msra.mxu0 %v371_v7 }
  0x37   :  { %342 = vmatprep.subr.bf16.mxu0 %v372_v8 }
  0x3a   :  { %343 = vmatpush3.bf16.msra.mxu0 %v373_v9 }
  0x3b   :  { %344 = vmatprep.subr.bf16.mxu0 %v374_v10 }
  0x3e   :  { %345 = vmatpush3.bf16.msra.mxu0 %v375_v11 }
  0x3f   :  { %346 = vmatprep.subr.bf16.mxu0 %v376_v16 }
  0x42   :  { %347 = vmatpush3.bf16.msra.mxu0 %v377_v17 }
  0x43   :  { %348 = vmatprep.subr.bf16.mxu0 %v378_v20 }
  0x46   :  { %349 = vmatpush3.bf16.msra.mxu0 %v379_v24 }
  0x49   :  { %271 = vmatmul.mubr.bf16.vlgmr.msra.gmra.mrb[0].mxu0 %v108_v25 }
 0x11c   :  { %v350_v26 = vpop.f32.mrb[0].mxu0 }
 0x11d   :  { %v351_v27 = vpop.f32.mrb[1].mxu0 }
 0x11e   :  { %v352_v29 = vadd.f32 %v351_v27, %v350_v26  ;;  %v353_v30 = vpop.f32.mrb[2].mxu0 }
 0x11f   :  { %v354_v31 = vpop.f32.mrb[3].mxu0 }
 0x120   :  { %v295_v32 = vadd.f32 %v352_v29, %v333_v28  ;;  %v355_v33 = vadd.f32 %v354_v31, %v353_v30 }
 0x122   :  { %297 = vst [vmem:[#allocation8] sm:$0xff] %v295_v32  ;;  %v296_v34 = vadd.f32 %v355_v33, %v333_v28 }
 0x124   :  { %298 = vst [vmem:[#allocation8 + $0x8] sm:$0xff] %v296_v34 }
 0x125   :  { %303 = vsyncadd [#allocation5], 224  ;;  %s464_s12 = smov [#allocation8]  }
 0x126   :  { %s304_s13 = sshll.u32 %s464_s12, 4  ;;  %s305_s13 = int_to_ptr.vmem [resolvable:$true] %s304_s13 }
 0x127   :  { %s432_s14 = scalar_lea.vmem %s305_s13, 32  ;;  %s436_s15 = scalar_lea.vmem %s305_s13, 256 }
 0x128   :  { %p433_p2 = scmp.ne.s32.totalorder %s305_s13, %s432_s14  ;;  %p437_p3 = scmp.lt.s32.totalorder %s305_s13, %s305_s13 }
 0x129   :  { %p438_p4 = scmp.lt.s32.totalorder %s436_s15, %s432_s14 }
 0x12b   :  { %p439_p5 = por %p438_p4, %p437_p3 }
 0x12d   :  { %p440_p6 = pnand %p439_p5, %p433_p2 }
 0x12f   :  { %443 = shalt.err (!%p440_p6)
}
 0x130   :  { %s444_s17 = scalar_lea.hbm %s529_s3, 32 }
 0x131   :  { %p445_p7 = scmp.ne.s32.totalorder %s529_s3, %s444_s17  ;;  %p448_p8 = scmp.lt.u32.totalorder %s444_s17, %s529_s3 }
 0x133   :  { %p450_p9 = pnand %p448_p8, %p445_p7 }
 0x135   :  { %453 = shalt.err (!%p450_p9)
}
 0x136   :  { %s465_s22 = smov 32   ;;  %s466_s23 = smov 2  }
 0x137   :  { %310 = dma.vmem_to_hbm [thread:$0]  %s305_s13, 32, %s529_s3, [#allocation5], %s465_s22, %s465_s22, %s466_s23  }
 0x138   :  { %458 = dma.done.wait [#allocation5], 256  }
 0x139   :  { %459 = vsyncadd [#allocation5], 4294967040 }
 0x13a   :  { %314 = vsyncpa [#allocation4], 1 }
 0x13b   :  { %315 = vsyncpa [#allocation7], 1 }
 0x13c   :  { %316 = vsyncpa [#allocation5], 1 }

</bundles_post_ra>
